<compile_context>
chip_gen: v6e
topology: v6e:2x2x1
jax: 0.10.0
libtpu: 0.0.40
codegen_flags: <defaults>
</compile_context>

<pallas_src>
import jax
import jax.numpy as jnp
from jax.experimental import pallas as pl
from jax.experimental.pallas import tpu as pltpu

_LANE = 128      # lane width (last dim)
_SUBLANE = 8     # sublane width (second-to-last dim)


def _round_up(n, m):
    return ((n + m - 1) // m) * m


def _cdiv(a, b):
    return (a + b - 1) // b


def _head_kernel(x_ref, w1_ref, b1_ref, w2_ref, b2_ref, o_ref):
    # Cast the activation tile in-kernel (VPU op, hidden under the MXU) so the
    # wrapper never spends an extra HBM pass on an astype.
    x = x_ref[...].astype(w1_ref.dtype)
    # dense: [tb, Dp] @ [Dp, Ip] -> f32 accumulation on the MXU.
    h = jnp.dot(x, w1_ref[...], preferred_element_type=jnp.float32)
    # bias-add + tanh in f32 (EUP slot; f32 transcendental path needed on v5e).
    h = jnp.tanh(h + b1_ref[...].astype(jnp.float32))
    # out_proj: [tb, Ip] @ [Ip, Cp] -> f32 accumulation.
    out = jnp.dot(h.astype(w2_ref.dtype), w2_ref[...],
                  preferred_element_type=jnp.float32)
    out = out + b2_ref[...].astype(jnp.float32)
    # Lane-dense store: Cp is always a multiple of 128.
    o_ref[...] = out.astype(o_ref.dtype)


def _pad2d(a, rows, cols):
    pr, pc = rows - a.shape[0], cols - a.shape[1]
    if pr == 0 and pc == 0:
        return a
    return jnp.pad(a, ((0, pr), (0, pc)))


def prepare_params(w1, b1, w2, b2, *, use_bf16=True):
    """Pad/cast parameters ONCE at init time (hoisted out of the forward path).

    Zero-padding is exact w.r.t. the math: padded input columns multiply zero
    rows of w1, padded inner lanes have zero bias (tanh(0) = 0) and feed zero
    rows of w2, and padded class lanes are sliced off after the kernel.
    Biases stay f32 so the in-kernel bias-add / tanh remain f32.
    """
    D_in, D_inner = w1.shape
    C = w2.shape[1]
    Dp = _round_up(D_in, _LANE)
    Ip = _round_up(D_inner, _LANE)
    Cp = _round_up(C, _LANE)
    w_dtype = jnp.bfloat16 if use_bf16 else w1.dtype
    return {
        "w1": _pad2d(w1, Dp, Ip).astype(w_dtype),
        "b1": _pad2d(b1.reshape(1, D_inner), 1, Ip).astype(jnp.float32),
        "w2": _pad2d(w2, Ip, Cp).astype(w_dtype),
        "b2": _pad2d(b2.reshape(1, C), 1, Cp).astype(jnp.float32),
        "dims": (D_in, D_inner, C),
    }


def _vmem_limit(est_bytes):
    # 1.5x margin over the explicit budget, floor 16 MiB for compiler scratch,
    # cap 64 MiB so the default config is portable to v7x (64 MiB physical).
    return int(min(max(3 * est_bytes // 2, 16 << 20), 64 << 20))


def bart_classification_head(x, params, *, block_b=512, gridless_max_b=128,
                             out_dtype=None):
    """x: [B, input_dim] (f32 or bf16); params: output of prepare_params().

    block_b: target batch-tile size for the tiled path (swept upward on
    v5e/v6e if desired; the default keeps the VMEM budget well under 32 MiB
    scoped even on v7x).  gridless_max_b: largest batch that takes the
    single-invocation (no-grid) path; above it we always emit >= 2 grid steps
    so both v7x TensorCores are used.
    """
    w1p, b1p, w2p, b2p = params["w1"], params["b1"], params["w2"], params["b2"]
    D_in, _, C = params["dims"]
    B, d = x.shape
    if d != D_in:
        raise ValueError(f"x feature dim {d} != expected {D_in}")
    Dp, Ip = w1p.shape
    Cp = w2p.shape[1]
    out_dtype = out_dtype or x.dtype

    # Feature padding is a no-op for BART base/large (768/1024 already 128-mult).
    if Dp != D_in:
        x = jnp.pad(x, ((0, 0), (0, Dp - D_in)))

    x_bytes = x.dtype.itemsize
    w_bytes = w1p.dtype.itemsize
    o_bytes = jnp.dtype(out_dtype).itemsize
    weight_bytes = (Dp * Ip + Ip * Cp) * w_bytes + (Ip + Cp) * 4

    if B <= gridless_max_b:
        # Single invocation: no grid, no pipeline scaffolding; everything
        # resident in VMEM for the few-hundred-cycle kernel.
        Bp = _round_up(B, _SUBLANE)
        if Bp != B:
            x = jnp.pad(x, ((0, Bp - B), (0, 0)))
        est = (Bp * Dp * x_bytes + Bp * Cp * o_bytes + weight_bytes
               + Bp * Ip * (4 + w_bytes) + Bp * Cp * 4)
        vmem_spec = pl.BlockSpec(memory_space=pltpu.MemorySpace.VMEM)
        out = pl.pallas_call(
            _head_kernel,
            out_shape=jax.ShapeDtypeStruct((Bp, Cp), out_dtype),
            in_specs=[vmem_spec] * 5,
            out_specs=vmem_spec,
            compiler_params=pltpu.CompilerParams(
                vmem_limit_bytes=_vmem_limit(est)),
        )(x, w1p, b1p, w2p, b2p)
    else:
        # Batch-tiled path. Always >= 2 steps (megacore sharding on v7x); the
        # tile is derived from the batch so we never pad B up to a full fixed
        # tile multiple (worst-case padding is < 8 * n_steps rows).
        n_steps = max(2, _cdiv(B, block_b))
        tb = _round_up(_cdiv(B, n_steps), _SUBLANE)
        Bp = n_steps * tb
        if Bp != B:
            x = jnp.pad(x, ((0, Bp - B), (0, 0)))
        # Budget: double-buffered x/out tiles, BOTH default buffers for the
        # VMEM-resident weights/biases (constant index_map), and the [tb, Ip]
        # f32 intermediate plus its cast copy for the second matmul.
        est = (2 * tb * Dp * x_bytes + 2 * tb * Cp * o_bytes
               + 2 * weight_bytes
               + tb * Ip * (4 + w_bytes) + tb * Cp * 4)
        out = pl.pallas_call(
            _head_kernel,
            out_shape=jax.ShapeDtypeStruct((Bp, Cp), out_dtype),
            grid=(n_steps,),
            in_specs=[
                pl.BlockSpec((tb, Dp), lambda i: (i, 0)),
                pl.BlockSpec((Dp, Ip), lambda i: (0, 0)),
                pl.BlockSpec((1, Ip), lambda i: (0, 0)),
                pl.BlockSpec((Ip, Cp), lambda i: (0, 0)),
                pl.BlockSpec((1, Cp), lambda i: (0, 0)),
            ],
            out_specs=pl.BlockSpec((tb, Cp), lambda i: (i, 0)),
            compiler_params=pltpu.CompilerParams(
                dimension_semantics=("parallel",),
                vmem_limit_bytes=_vmem_limit(est)),
        )(x, w1p, b1p, w2p, b2p)

    # Slice padded batch rows / padded class lanes off outside the kernel.
    return out[:B, :C]


def init_params(key, input_dim, inner_dim, num_classes, dtype=jnp.float32):
    k1, k2, k3, k4 = jax.random.split(key, 4)
    w1 = jax.random.normal(k1, (input_dim, inner_dim), dtype) / jnp.sqrt(input_dim)
    b1 = jax.random.normal(k2, (1, inner_dim), dtype) * 0.01
    w2 = jax.random.normal(k3, (inner_dim, num_classes), dtype) / jnp.sqrt(inner_dim)
    b2 = jax.random.normal(k4, (1, num_classes), dtype) * 0.01
    return w1, b1, w2, b2


def _reference(x, w1, b1, w2, b2):
    return jnp.tanh(x @ w1 + b1) @ w2 + b2


if __name__ == "__main__":
    key = jax.random.PRNGKey(0)
    kx, kp, kx2 = jax.random.split(key, 3)

    batch = 8
    input_dim = 32
    inner_dim = 32
    num_classes = 8

    x = jax.random.normal(kx, (batch, input_dim), jnp.float32)
    w1, b1, w2, b2 = init_params(kp, input_dim, inner_dim, num_classes)
    ref = _reference(x, w1, b1, w2, b2)

    params_f32 = prepare_params(w1, b1, w2, b2, use_bf16=False)
    params_bf16 = prepare_params(w1, b1, w2, b2)          # bf16 MXU (default)

    # --- gridless small-batch path, exact f32 mode ---
    out = jax.block_until_ready(bart_classification_head(x, params_f32))
    assert out.shape == (batch, num_classes)
    assert jnp.allclose(out, ref, atol=1e-5, rtol=1e-5)

    # --- gridless small-batch path, default bf16 MXU mode (lower precision) ---
    out_bf = jax.block_until_ready(bart_classification_head(x, params_bf16))
    assert out_bf.shape == (batch, num_classes)
    assert jnp.allclose(out_bf, ref, atol=5e-2, rtol=5e-2)

    # --- batch-tiled path (>= 2 "parallel" grid steps, non-multiple batch) ---
    big_batch = 300
    x_big = jax.random.normal(kx2, (big_batch, input_dim), jnp.float32)
    ref_big = _reference(x_big, w1, b1, w2, b2)

    out_big = jax.block_until_ready(
        bart_classification_head(x_big, params_f32, block_b=128))
    assert out_big.shape == (big_batch, num_classes)
    assert jnp.allclose(out_big, ref_big, atol=1e-5, rtol=1e-5)

    out_big_bf = jax.block_until_ready(
        bart_classification_head(x_big, params_bf16, block_b=128))
    assert out_big_bf.shape == (big_batch, num_classes)
    assert jnp.allclose(out_big_bf, ref_big, atol=5e-2, rtol=5e-2)

    print("KERNEL_OK")
</pallas_src>

<mosaic_0001>
module attributes {stable_mosaic.version = 11 : i64} {
  func.func @_head_kernel(%arg0: memref<8x128xf32, #tpu.memory_space<vmem>>, %arg1: memref<128x128xf32, #tpu.memory_space<vmem>>, %arg2: memref<1x128xf32, #tpu.memory_space<vmem>>, %arg3: memref<128x128xf32, #tpu.memory_space<vmem>>, %arg4: memref<1x128xf32, #tpu.memory_space<vmem>>, %arg5: memref<8x128xf32, #tpu.memory_space<vmem>>) attributes {dimension_semantics = [], scalar_prefetch = 0 : i64, scratch_operands = 0 : i64, tpu.core_type = #tpu.core_type<tc>} {
    %c0 = arith.constant 0 : index
    %c0_0 = arith.constant 0 : index
    %0 = vector.load %arg0[%c0, %c0_0] : memref<8x128xf32, #tpu.memory_space<vmem>>, vector<8x128xf32>
    %c0_1 = arith.constant 0 : index
    %c0_2 = arith.constant 0 : index
    %1 = vector.load %arg1[%c0_1, %c0_2] : memref<128x128xf32, #tpu.memory_space<vmem>>, vector<128x128xf32>
    %cst = arith.constant dense<0.000000e+00> : vector<8x128xf32>
    %2 = tpu.matmul %0, %1, %cst {dimension_numbers = #tpu.dot_dimension_numbers<[1], [0], [0], [1], [0, 0, 1, 1], [], []>} : vector<8x128xf32>, vector<128x128xf32>, vector<8x128xf32> -> vector<8x128xf32>
    %c0_3 = arith.constant 0 : index
    %c0_4 = arith.constant 0 : index
    %3 = vector.load %arg2[%c0_3, %c0_4] : memref<1x128xf32, #tpu.memory_space<vmem>>, vector<1x128xf32>
    %4 = vector.broadcast %3 : vector<1x128xf32> to vector<8x128xf32>
    %5 = arith.addf %2, %4 : vector<8x128xf32>
    %6 = math.tanh %5 : vector<8x128xf32>
    %c0_5 = arith.constant 0 : index
    %c0_6 = arith.constant 0 : index
    %7 = vector.load %arg3[%c0_5, %c0_6] : memref<128x128xf32, #tpu.memory_space<vmem>>, vector<128x128xf32>
    %cst_7 = arith.constant dense<0.000000e+00> : vector<8x128xf32>
    %8 = tpu.matmul %6, %7, %cst_7 {dimension_numbers = #tpu.dot_dimension_numbers<[1], [0], [0], [1], [0, 0, 1, 1], [], []>} : vector<8x128xf32>, vector<128x128xf32>, vector<8x128xf32> -> vector<8x128xf32>
    %c0_8 = arith.constant 0 : index
    %c0_9 = arith.constant 0 : index
    %9 = vector.load %arg4[%c0_8, %c0_9] : memref<1x128xf32, #tpu.memory_space<vmem>>, vector<1x128xf32>
    %10 = vector.broadcast %9 : vector<1x128xf32> to vector<8x128xf32>
    %11 = arith.addf %8, %10 : vector<8x128xf32>
    %c0_10 = arith.constant 0 : index
    %c0_11 = arith.constant 0 : index
    %12 = vector.load %arg5[%c0_10, %c0_11] : memref<8x128xf32, #tpu.memory_space<vmem>>, vector<8x128xf32>
    tpu.vector_store %arg5[%c0_10, %c0_11], %11 {strides = array<i32>} : memref<8x128xf32, #tpu.memory_space<vmem>>, vector<8x128xf32>,
    return
  }
}

</mosaic_0001>

<bundles_post_ra>
// kernel: tpu_custom_call.1
= control target key start
LH: loop header
LB: loop body
LE: loop exit
PB: predicated region body
PF: predicated region fallthrough
CT: control target
= control target key end

     0   :  { %10 = vsyncpa [#allocation3], 0  ;;  %s557_s0 = inlined_call_operand.hbm [shape: f32[8,128], index: 0, kind: input, shape index: {}]   ;;  %s558_s1 = inlined_call_operand.hbm [shape: f32[128,128], index: 1, kind: input, shape index: {}]   ;;  %s559_s2 = inlined_call_operand.vmem [shape: f32[1,128], index: 2, kind: input, shape index: {}]   ;;  %s560_s3 = inlined_call_operand.hbm [shape: f32[128,128], index: 3, kind: input, shape index: {}]   ;;  %s561_s4 = inlined_call_operand.vmem [shape: f32[1,128], index: 4, kind: input, shape index: {}]   ;;  %s562_s5 = inlined_call_operand.hbm [shape: f32[8,128], index: 5, kind: output, shape index: {}]  }
   0x1   :  { %11 = vsyncpa [#allocation6], 0 }
   0x2   :  { %12 = vsyncpa [#allocation4], 0  ;;  %s467_s18 = smov [#allocation5]  }
   0x3   :  { %s28_s19 = sshll.u32 %s467_s18, 4  ;;  %s29_s19 = int_to_ptr.vmem [resolvable:$true] %s28_s19 }
   0x4   :  { %s389_s20 = scalar_lea.vmem %s29_s19, 2048  ;;  %p394_p1 = scmp.lt.s32.totalorder %s29_s19, %s29_s19 }
   0x5   :  { %p390_p0 = scmp.ne.s32.totalorder %s29_s19, %s389_s20  ;;  %p395_p2 = scmp.lt.s32.totalorder %s389_s20, %s389_s20 }
   0x7   :  { %p396_p3 = por %p395_p2, %p394_p1 }
   0x9   :  { %p397_p4 = pnand %p396_p3, %p390_p0 }
   0xb   :  { %400 = shalt.err (!%p397_p4)
}
   0xc   :  { %s468_s21 = smov 128   ;;  %s469_s22 = smov 8  }
   0xd   :  { %34 = dma.hbm_to_vmem [thread:$0]  %s558_s1, 2048, %s29_s19, [#allocation6], %s468_s21, %s468_s21, %s469_s22  }
   0xe   :  { %s470_s25 = smov [#allocation2]   ;;  %s471_s27 = smov [#allocation7]  }
   0xf   :  { %s19_s26 = sshll.u32 %s470_s25, 4  ;;  %s42_s28 = sshll.u32 %s471_s27, 4  ;;  %s20_s26 = int_to_ptr.vmem [resolvable:$true] %s19_s26  ;;  %s43_s28 = int_to_ptr.vmem [resolvable:$true] %s42_s28 }
  0x10   :  { %s409_s29 = scalar_lea.vmem %s20_s26, 128  ;;  %p414_p6 = scmp.lt.s32.totalorder %s20_s26, %s20_s26 }
  0x11   :  { %p410_p5 = scmp.ne.s32.totalorder %s20_s26, %s409_s29  ;;  %p415_p7 = scmp.lt.s32.totalorder %s409_s29, %s409_s29 }
  0x13   :  { %p416_p8 = por %p415_p7, %p414_p6 }
  0x15   :  { %p417_p9 = pnand %p416_p8, %p410_p5 }
  0x17   :  { %420 = shalt.err (!%p417_p9)
}
  0x18   :  { %22 = dma.hbm_to_vmem [thread:$0]  %s557_s0, 128, %s20_s26, [#allocation3]  }
  0x19   :  { %s429_s7 = scalar_lea.vmem %s43_s28, 2048  ;;  %p434_p11 = scmp.lt.s32.totalorder %s43_s28, %s43_s28 }
  0x1a   :  { %p430_p10 = scmp.ne.s32.totalorder %s43_s28, %s429_s7  ;;  %p435_p12 = scmp.lt.s32.totalorder %s429_s7, %s429_s7 }
  0x1c   :  { %p436_p13 = por %p435_p12, %p434_p11 }
  0x1e   :  { %p437_p0 = pnand %p436_p13, %p430_p10 }
  0x20   :  { %440 = shalt.err (!%p437_p0)
}
  0x21   :  { %48 = dma.hbm_to_vmem [thread:$0]  %s560_s3, 2048, %s43_s28, [#allocation6], %s468_s21, %s468_s21, %s469_s22  }
  0x22   :  { %461 = dma.done.wait [#allocation3], 128  }
  0x23   :  { %462 = vsyncadd [#allocation3], 4294967168 }
  0x24   :  { %463 = dma.done.wait [#allocation6], 4096  }
  0x25   :  { %464 = vsyncadd [#allocation6], 4294963200  ;;  %v472_v0 = vmov 0.0   ;;  %vm473_vm0 = vmmov 0   ;;  %v76_v1 = vld [vmem:[#allocation5 + $0x78] sm:$0xff]  ;;  %v75_v2 = vld [vmem:[#allocation5 + $0x70] sm:$0xff] }
  0x26   :  { %301 = vmatprep.subr.mxu0 %v472_v0  ;;  %333 = vmatprep.mubr.msk.f32.mxu0 %vm473_vm0, %v472_v0  ;;  %v74_v3 = vld [vmem:[#allocation5 + $0x68] sm:$0xff]  ;;  %v73_v4 = vld [vmem:[#allocation5 + $0x60] sm:$0xff]  ;;  %v170_v5 = vld [vmem:[#allocation7 + $0x78] sm:$0xff]  ;;  %s474_s11 = smov [#allocation8]  }
  0x27   :  { %336 = vmatprep.subr.mxu1 %v472_v0  ;;  %368 = vmatprep.mubr.msk.f32.mxu1 %vm473_vm0, %v472_v0  ;;  %v72_v6 = vld [vmem:[#allocation5 + $0x58] sm:$0xff]  ;;  %v169_v7 = vld [vmem:[#allocation7 + $0x70] sm:$0xff]  ;;  %v168_v8 = vld [vmem:[#allocation7 + $0x68] sm:$0xff]  ;;  %s255_s12 = sshll.u32 %s474_s11, 4  ;;  %s256_s12 = int_to_ptr.vmem [resolvable:$true] %s255_s12 }
  0x28   :  { %302 = vmatpush3.msra.mxu0 %v76_v1  ;;  %337 = vmatpush3.msra.mxu1 %v170_v5  ;;  %v71_v9 = vld [vmem:[#allocation5 + $0x50] sm:$0xff]  ;;  %v167_v10 = vld [vmem:[#allocation7 + $0x60] sm:$0xff]  ;;  %v70_v11 = vld [vmem:[#allocation5 + $0x48] sm:$0xff]  ;;  %s441_s13 = scalar_lea.vmem %s256_s12, 128  ;;  %p446_p2 = scmp.lt.s32.totalorder %s256_s12, %s256_s12 }
  0x29   :  { %303 = vmatprep.subr.mxu0 %v472_v0  ;;  %338 = vmatprep.subr.mxu1 %v472_v0  ;;  %v166_v12 = vld [vmem:[#allocation7 + $0x58] sm:$0xff]  ;;  %v69_v13 = vld [vmem:[#allocation5 + $0x40] sm:$0xff]  ;;  %v165_v14 = vld [vmem:[#allocation7 + $0x50] sm:$0xff]  ;;  %p442_p1 = scmp.ne.s32.totalorder %s256_s12, %s441_s13  ;;  %p447_p3 = scmp.lt.s32.totalorder %s441_s13, %s441_s13 }
  0x2a   :  { %304 = vmatpush3.msra.mxu0 %v75_v2  ;;  %339 = vmatpush3.msra.mxu1 %v169_v7  ;;  %v68_v15 = vld [vmem:[#allocation5 + $0x38] sm:$0xff]  ;;  %v164_v16 = vld [vmem:[#allocation7 + $0x48] sm:$0xff]  ;;  %v67_v17 = vld [vmem:[#allocation5 + $0x30] sm:$0xff] }
  0x2b   :  { %305 = vmatprep.subr.mxu0 %v472_v0  ;;  %340 = vmatprep.subr.mxu1 %v472_v0  ;;  %v66_v18 = vld [vmem:[#allocation5 + $0x28] sm:$0xff]  ;;  %v65_v19 = vld [vmem:[#allocation5 + $0x20] sm:$0xff]  ;;  %v64_v20 = vld [vmem:[#allocation5 + $0x18] sm:$0xff]  ;;  %p448_p4 = por %p447_p3, %p446_p2 }
  0x2c   :  { %306 = vmatpush3.msra.mxu0 %v74_v3  ;;  %341 = vmatpush3.msra.mxu1 %v168_v8  ;;  %v63_v21 = vld [vmem:[#allocation5 + $0x10] sm:$0xff]  ;;  %v62_v22 = vld [vmem:[#allocation5 + $0x8] sm:$0xff]  ;;  %v61_v23 = vld [vmem:[#allocation5] sm:$0xff] }
  0x2d   :  { %307 = vmatprep.subr.mxu0 %v472_v0  ;;  %342 = vmatprep.subr.mxu1 %v472_v0  ;;  %v60_v24 = vld [vmem:[#allocation2] sm:$0xff]  ;;  %v163_v25 = vld [vmem:[#allocation7 + $0x40] sm:$0xff]  ;;  %v161_v27 = vld [vmem:[#allocation7 + $0x30] sm:$0xff]  ;;  %p449_p5 = pnand %p448_p4, %p442_p1 }
  0x2e   :  { %308 = vmatpush3.msra.mxu0 %v73_v4  ;;  %343 = vmatpush3.msra.mxu1 %v167_v10  ;;  %v162_v26 = vld [vmem:[#allocation7 + $0x38] sm:$0xff]  ;;  %v160_v28 = vld [vmem:[#allocation7 + $0x28] sm:$0xff]  ;;  %v159_v29 = vld [vmem:[#allocation7 + $0x20] sm:$0xff] }
  0x2f   :  { %309 = vmatprep.subr.mxu0 %v472_v0  ;;  %344 = vmatprep.subr.mxu1 %v472_v0  ;;  %v158_v30 = vld [vmem:[#allocation7 + $0x18] sm:$0xff]  ;;  %v157_v31 = vld [vmem:[#allocation7 + $0x10] sm:$0xff]  ;;  %v156_v32 = vld [vmem:[#allocation7 + $0x8] sm:$0xff] }
  0x30   :  { %310 = vmatpush3.msra.mxu0 %v72_v6  ;;  %345 = vmatpush3.msra.mxu1 %v166_v12  ;;  %v155_v33 = vld [vmem:[#allocation7] sm:$0xff]  ;;  %v265_v34 = vld [vmem:[%s559_s2] ss:$0 sm:$0xff] }
  0x31   :  { %311 = vmatprep.subr.mxu0 %v472_v0  ;;  %346 = vmatprep.subr.mxu1 %v472_v0  ;;  %v266_v39 = vld [vmem:[%s561_s4] ss:$0 sm:$0xff] }
  0x32   :  { %312 = vmatpush3.msra.mxu0 %v71_v9  ;;  %347 = vmatpush3.msra.mxu1 %v165_v14 }
  0x33   :  { %313 = vmatprep.subr.mxu0 %v472_v0  ;;  %348 = vmatprep.subr.mxu1 %v472_v0 }
  0x34   :  { %314 = vmatpush3.msra.mxu0 %v70_v11  ;;  %349 = vmatpush3.msra.mxu1 %v164_v16 }
  0x35   :  { %315 = vmatprep.subr.mxu0 %v472_v0  ;;  %350 = vmatprep.subr.mxu1 %v472_v0 }
  0x36   :  { %316 = vmatpush3.msra.mxu0 %v69_v13  ;;  %351 = vmatpush3.msra.mxu1 %v163_v25 }
  0x37   :  { %317 = vmatprep.subr.mxu0 %v472_v0  ;;  %352 = vmatprep.subr.mxu1 %v472_v0 }
  0x38   :  { %318 = vmatpush3.msra.mxu0 %v68_v15  ;;  %353 = vmatpush3.msra.mxu1 %v162_v26 }
  0x39   :  { %319 = vmatprep.subr.mxu0 %v472_v0  ;;  %354 = vmatprep.subr.mxu1 %v472_v0 }
  0x3a   :  { %320 = vmatpush3.msra.mxu0 %v67_v17  ;;  %355 = vmatpush3.msra.mxu1 %v161_v27 }
  0x3b   :  { %321 = vmatprep.subr.mxu0 %v472_v0  ;;  %356 = vmatprep.subr.mxu1 %v472_v0 }
  0x3c   :  { %322 = vmatpush3.msra.mxu0 %v66_v18  ;;  %357 = vmatpush3.msra.mxu1 %v160_v28 }
  0x3d   :  { %323 = vmatprep.subr.mxu0 %v472_v0  ;;  %358 = vmatprep.subr.mxu1 %v472_v0 }
  0x3e   :  { %324 = vmatpush3.msra.mxu0 %v65_v19  ;;  %359 = vmatpush3.msra.mxu1 %v159_v29 }
  0x3f   :  { %325 = vmatprep.subr.mxu0 %v472_v0  ;;  %360 = vmatprep.subr.mxu1 %v472_v0 }
  0x40   :  { %326 = vmatpush3.msra.mxu0 %v64_v20  ;;  %361 = vmatpush3.msra.mxu1 %v158_v30 }
  0x41   :  { %327 = vmatprep.subr.mxu0 %v472_v0  ;;  %362 = vmatprep.subr.mxu1 %v472_v0 }
  0x42   :  { %328 = vmatpush3.msra.mxu0 %v63_v21  ;;  %363 = vmatpush3.msra.mxu1 %v157_v31 }
  0x43   :  { %329 = vmatprep.subr.mxu0 %v472_v0  ;;  %364 = vmatprep.subr.mxu1 %v472_v0 }
  0x44   :  { %330 = vmatpush3.msra.mxu0 %v62_v22  ;;  %365 = vmatpush3.msra.mxu1 %v156_v32 }
  0x45   :  { %331 = vmatprep.subr.mxu0 %v472_v0  ;;  %366 = vmatprep.subr.mxu1 %v472_v0 }
  0x46   :  { %332 = vmatpush3.msra.mxu0 %v61_v23  ;;  %367 = vmatpush3.msra.mxu1 %v155_v33 }
  0x47   :  { %334 = vmatmul.mubr.f32.vlgmr.msra.gmra.mxu0 %v60_v24 }
 0x107   :  { %v150_v35 = vpop.f32.mrf.mxu0 }
 0x108   :  { %v151_v36 = vadd.f32 %v265_v34, %v150_v35 }
 0x109   :  { %v335_v37 = vpop.f32.mrf.mxu0 }
 0x10a   :  { %379 = vtanh.f32 %v151_v36 }
 0x117   :  { %v380_v38 = vpop.eup %379 }
 0x118   :  { %369 = vmatmul.mubr.f32.vlgmr.msra.gmra.mxu1 %v380_v38 }
 0x1d8   :  { %v244_v40 = vpop.f32.mrf.mxu1 }
 0x1d9   :  { %v245_v41 = vadd.f32 %v266_v39, %v244_v40 }
 0x1da   :  { %v370_v42 = vpop.f32.mrf.mxu1 }
 0x1db   :  { %248 = vst [vmem:[#allocation8] sm:$0xff] %v245_v41 }
 0x1dc   :  { %452 = shalt.err (!%p449_p5)
}
 0x1dd   :  { %258 = dma.vmem_to_hbm [thread:$0]  %s256_s12, 128, %s562_s5, [#allocation4]  }
 0x1de   :  { %465 = dma.done.wait [#allocation4], 128  }
 0x1df   :  { %466 = vsyncadd [#allocation4], 4294967168 }
 0x1e0   :  { %262 = vsyncpa [#allocation3], 1 }
 0x1e1   :  { %263 = vsyncpa [#allocation6], 1 }
 0x1e2   :  { %264 = vsyncpa [#allocation4], 1 }

</bundles_post_ra>
